<compile_context>
chip_gen: v7x
topology: tpu7x:2x2x1
jax: 0.10.0
libtpu: 0.0.40
codegen_flags: <defaults>
</compile_context>

<pallas_src>
import functools
import math

import jax
import jax.numpy as jnp
from jax.experimental import pallas as pl
from jax.experimental.pallas import tpu as pltpu

NUM_TIMESTEPS = 1000
HIDDEN = 32


# ----------------------------------------------------------------------------
# Pallas kernel: one grid step == one sample
# ----------------------------------------------------------------------------
def ddpm_loss_kernel(sa_ref, s1m_ref, x_ref, eps_ref, w1_ref, hb_ref, w2_ref,
                     b2_ref, loss_ref, *, inv_count):
    # sa_ref, s1m_ref : (B,) f32 in SMEM -- sqrt(acp[t]), sqrt(1 - acp[t])
    # x_ref, eps_ref  : (C, HW) f32      -- this sample's image / noise
    # w1_ref          : (HID, C) bf16
    # hb_ref          : (HID, HW) f32    -- lane-dense per-sample hidden bias
    # w2_ref          : (C, HID) bf16
    # b2_ref          : (C, HW) f32      -- lane-dense output bias
    # loss_ref        : (8, 128) f32     -- per-sample loss splatted (full vreg)
    b = pl.program_id(0)
    sa = sa_ref[b]                          # scalar from SMEM
    s1m = s1m_ref[b]

    eps = eps_ref[...]                      # (C, HW) f32
    x_t = sa * x_ref[...] + s1m * eps       # q_sample, scalar*vector on VPU

    # layer 1: bf16 MXU matmul, f32 accumulate, + lane-dense per-sample bias
    h = jnp.dot(w1_ref[...], x_t.astype(jnp.bfloat16),
                preferred_element_type=jnp.float32) + hb_ref[...]
    h = h * jax.nn.sigmoid(h)               # SiLU (EUP + VPU)

    # layer 2: bf16 MXU matmul, f32 accumulate, + lane-dense bias
    eps_pred = jnp.dot(w2_ref[...], h.astype(jnp.bfloat16),
                       preferred_element_type=jnp.float32) + b2_ref[...]

    # per-sample MSE over C*HW (kept 2-D: lane reduce, then sublane reduce)
    d = eps_pred - eps
    col = jnp.sum(d * d, axis=1, keepdims=True)        # (C, 1)
    tot = jnp.sum(col, axis=0, keepdims=True)          # (1, 1)
    loss_ref[...] = jnp.broadcast_to(tot * inv_count, loss_ref.shape)


# ----------------------------------------------------------------------------
# Glue: schedule, time embedding, parameters, pallas_call wrapper
# ----------------------------------------------------------------------------
def linear_betas(num_timesteps=NUM_TIMESTEPS):
    scale = 1000.0 / num_timesteps
    return jnp.linspace(scale * 1e-4, scale * 2e-2, num_timesteps,
                        dtype=jnp.float32)


def timestep_embedding(t, dim, max_period=10000.0):
    half = dim // 2
    freqs = jnp.exp(-math.log(max_period)
                    * jnp.arange(half, dtype=jnp.float32) / half)
    args = t.astype(jnp.float32)[:, None] * freqs[None, :]
    return jnp.concatenate([jnp.cos(args), jnp.sin(args)], axis=-1)


def init_params(key, ch, hidden=HIDDEN):
    ks = jax.random.split(key, 6)
    s = 0.05
    return {
        "w1": s * jax.random.normal(ks[0], (hidden, ch), jnp.float32),
        "b1": s * jax.random.normal(ks[1], (hidden,), jnp.float32),
        "w2": s * jax.random.normal(ks[2], (ch, hidden), jnp.float32),
        "b2": s * jax.random.normal(ks[3], (ch, 1), jnp.float32),
        "wt1": s * jax.random.normal(ks[4], (hidden, hidden), jnp.float32),
        "bt1": jnp.zeros((hidden,), jnp.float32),
        "wt2": s * jax.random.normal(ks[5], (hidden, hidden), jnp.float32),
        "bt2": jnp.zeros((hidden,), jnp.float32),
    }


def ddpm_training_loss(x, t, noise, params, betas):
    """x: (B, C, H, W) NCHW (PyTorch convention). Returns per-sample loss (B,)."""
    B, C, H, W = x.shape
    HW = H * W

    # natural (B, C, HW) layout -- a free reshape, no transpose / HBM round-trip
    x3 = x.reshape(B, C, HW).astype(jnp.float32)
    eps3 = noise.reshape(B, C, HW).astype(jnp.float32)

    alphas_cumprod = jnp.cumprod(1.0 - betas)
    sa = jnp.sqrt(alphas_cumprod)[t].astype(jnp.float32)          # (B,)
    s1m = jnp.sqrt(1.0 - alphas_cumprod)[t].astype(jnp.float32)   # (B,)

    # time-conditioning MLP (tiny glue) -> per-sample hidden bias, then
    # pre-broadcast to a lane-dense (B, HID, HW) operand selected per grid step
    temb = timestep_embedding(t, HIDDEN)
    temb = jax.nn.silu(temb @ params["wt1"] + params["bt1"])
    temb = temb @ params["wt2"] + params["bt2"]                   # (B, HID)
    hbias = params["b1"][None, :] + temb                          # (B, HID)
    hbias_lanes = jnp.broadcast_to(hbias[:, :, None],
                                   (B, HIDDEN, HW)).astype(jnp.float32)

    # lane-dense output bias (no (C,1) degenerate block)
    b2_lanes = jnp.broadcast_to(params["b2"], (C, HW)).astype(jnp.float32)

    # bf16 weights for the MXU (f32 accumulation in-kernel)
    w1_bf16 = params["w1"].astype(jnp.bfloat16)
    w2_bf16 = params["w2"].astype(jnp.bfloat16)

    kernel = functools.partial(ddpm_loss_kernel,
                               inv_count=1.0 / float(C * HW))

    out = pl.pallas_call(
        kernel,
        out_shape=jax.ShapeDtypeStruct((B, 8, 128), jnp.float32),
        grid=(B,),
        in_specs=[
            pl.BlockSpec(memory_space=pltpu.MemorySpace.SMEM),        # sa (B,)
            pl.BlockSpec(memory_space=pltpu.MemorySpace.SMEM),        # s1m (B,)
            pl.BlockSpec((None, C, HW), lambda b: (b, 0, 0)),         # x sample b
            pl.BlockSpec((None, C, HW), lambda b: (b, 0, 0)),         # eps sample b
            pl.BlockSpec((HIDDEN, C), lambda b: (0, 0)),              # w1 (bf16)
            pl.BlockSpec((None, HIDDEN, HW), lambda b: (b, 0, 0)),    # hbias sample b
            pl.BlockSpec((C, HIDDEN), lambda b: (0, 0)),              # w2 (bf16)
            pl.BlockSpec((C, HW), lambda b: (0, 0)),                  # b2 lane-dense
        ],
        out_specs=pl.BlockSpec((None, 8, 128), lambda b: (b, 0, 0)),
        compiler_params=pltpu.CompilerParams(
            dimension_semantics=("parallel",)),
    )(sa, s1m, x3, eps3, w1_bf16, hbias_lanes, w2_bf16, b2_lanes)

    return out[:, 0, 0]


def ddpm_training_loss_ref(x, t, noise, params, betas):
    """Pure-JAX f32 reference for correctness checking."""
    B, C, H, W = x.shape
    x2 = x.reshape(B, C, H * W).astype(jnp.float32)
    eps = noise.reshape(B, C, H * W).astype(jnp.float32)

    acp = jnp.cumprod(1.0 - betas)
    sa = jnp.sqrt(acp)[t][:, None, None]
    s1m = jnp.sqrt(1.0 - acp)[t][:, None, None]
    x_t = sa * x2 + s1m * eps

    temb = timestep_embedding(t, HIDDEN)
    temb = jax.nn.silu(temb @ params["wt1"] + params["bt1"])
    temb = temb @ params["wt2"] + params["bt2"]
    hbias = (params["b1"][None, :] + temb)[:, :, None]

    h = jnp.einsum("hc,bcp->bhp", params["w1"], x_t) + hbias
    h = jax.nn.silu(h)
    eps_pred = jnp.einsum("ch,bhp->bcp", params["w2"], h) + params["b2"][None]
    return jnp.mean((eps_pred - eps) ** 2, axis=(1, 2))


if __name__ == "__main__":
    key = jax.random.PRNGKey(0)
    k_x, k_t, k_n, k_p = jax.random.split(key, 4)

    # args: batch_size=2, set size=2, in_channels=4, image_size=16
    bs, ns, ch, img = 2, 2, 4, 16
    x_set = jax.random.normal(k_x, (bs, ns, ch, img, img), jnp.float32)

    # DDPM.forward: x = x_set.view(-1, ch, image_size, image_size)
    x = x_set.reshape(-1, ch, img, img)
    B = x.shape[0]
    t = jax.random.randint(k_t, (B,), 0, NUM_TIMESTEPS)
    noise = jax.random.normal(k_n, x.shape, jnp.float32)

    params = init_params(k_p, ch)
    betas = linear_betas()

    loss = ddpm_training_loss(x, t, noise, params, betas)
    loss = jax.block_until_ready(loss)

    ref = ddpm_training_loss_ref(x, t, noise, params, betas)
    assert loss.shape == (B,)
    assert bool(jnp.all(jnp.isfinite(loss)))
    assert bool(jnp.allclose(loss, ref, rtol=1e-3, atol=1e-3)), (loss, ref)

    print("KERNEL_OK")
</pallas_src>

<mosaic_0001>
module attributes {stable_mosaic.version = 11 : i64} {
  func.func @ddpm_loss_kernel(%arg0: i32, %arg1: memref<4xf32, #tpu.memory_space<smem>>, %arg2: memref<4xf32, #tpu.memory_space<smem>>, %arg3: memref<1x4x256xf32, #tpu.memory_space<vmem>>, %arg4: memref<1x4x256xf32, #tpu.memory_space<vmem>>, %arg5: memref<32x4xbf16, #tpu.memory_space<vmem>>, %arg6: memref<1x32x256xf32, #tpu.memory_space<vmem>>, %arg7: memref<4x32xbf16, #tpu.memory_space<vmem>>, %arg8: memref<4x256xf32, #tpu.memory_space<vmem>>, %arg9: memref<1x8x128xf32, #tpu.memory_space<vmem>>) attributes {dimension_semantics = [#tpu.dimension_semantics<parallel>], iteration_bounds = array<i64: 4>, scalar_prefetch = 0 : i64, scratch_operands = 0 : i64, tpu.core_type = #tpu.core_type<tc>, window_params = [{transform_indices = @transform_0, window_bounds = array<i64: 4>}, {transform_indices = @transform_1, window_bounds = array<i64: 4>}, {transform_indices = @transform_2, window_bounds = array<i64: 1, 4, 256>}, {transform_indices = @transform_3, window_bounds = array<i64: 1, 4, 256>}, {pipeline_mode = #tpu.pipeline_mode<synchronous>, transform_indices = @transform_4, window_bounds = array<i64: 32, 4>}, {transform_indices = @transform_5, window_bounds = array<i64: 1, 32, 256>}, {pipeline_mode = #tpu.pipeline_mode<synchronous>, transform_indices = @transform_6, window_bounds = array<i64: 4, 32>}, {pipeline_mode = #tpu.pipeline_mode<synchronous>, transform_indices = @transform_7, window_bounds = array<i64: 4, 256>}, {transform_indices = @transform_8, window_bounds = array<i64: 1, 8, 128>}]} {
    %0 = arith.index_cast %arg0 : i32 to index
    %1 = memref.load %arg1[%0] : memref<4xf32, #tpu.memory_space<smem>>
    %2 = arith.index_cast %arg0 : i32 to index
    %3 = memref.load %arg2[%2] : memref<4xf32, #tpu.memory_space<smem>>
    %c0 = arith.constant 0 : index
    %c0_0 = arith.constant 0 : index
    %c0_1 = arith.constant 0 : index
    %4 = vector.load %arg4[%c0, %c0_0, %c0_1] : memref<1x4x256xf32, #tpu.memory_space<vmem>>, vector<1x4x256xf32>
    %5 = vector.shape_cast %4 : vector<1x4x256xf32> to vector<4x256xf32>
    %c0_2 = arith.constant 0 : index
    %c0_3 = arith.constant 0 : index
    %c0_4 = arith.constant 0 : index
    %6 = vector.load %arg3[%c0_2, %c0_3, %c0_4] : memref<1x4x256xf32, #tpu.memory_space<vmem>>, vector<1x4x256xf32>
    %7 = vector.shape_cast %6 : vector<1x4x256xf32> to vector<4x256xf32>
    %8 = vector.broadcast %1 : f32 to vector<4x256xf32>
    %9 = arith.mulf %8, %7 : vector<4x256xf32>
    %10 = vector.broadcast %3 : f32 to vector<4x256xf32>
    %11 = arith.mulf %10, %5 : vector<4x256xf32>
    %12 = arith.addf %9, %11 : vector<4x256xf32>
    %c0_5 = arith.constant 0 : index
    %c0_6 = arith.constant 0 : index
    %13 = vector.load %arg5[%c0_5, %c0_6] : memref<32x4xbf16, #tpu.memory_space<vmem>>, vector<32x4xbf16>
    %14 = arith.truncf %12 : vector<4x256xf32> to vector<4x256xbf16>
    %cst = arith.constant dense<0.000000e+00> : vector<32x256xf32>
    %15 = tpu.matmul %13, %14, %cst {dimension_numbers = #tpu.dot_dimension_numbers<[1], [0], [0], [1], [0, 0, 1, 1], [], []>} : vector<32x4xbf16>, vector<4x256xbf16>, vector<32x256xf32> -> vector<32x256xf32>
    %c0_7 = arith.constant 0 : index
    %c0_8 = arith.constant 0 : index
    %c0_9 = arith.constant 0 : index
    %16 = vector.load %arg6[%c0_7, %c0_8, %c0_9] : memref<1x32x256xf32, #tpu.memory_space<vmem>>, vector<1x32x256xf32>
    %17 = vector.shape_cast %16 : vector<1x32x256xf32> to vector<32x256xf32>
    %18 = arith.addf %15, %17 : vector<32x256xf32>
    %19 = arith.negf %18 : vector<32x256xf32>
    %20 = math.exp %19 : vector<32x256xf32>
    %cst_10 = arith.constant 1.000000e+00 : f32
    %21 = vector.broadcast %cst_10 : f32 to vector<32x256xf32>
    %22 = arith.addf %21, %20 : vector<32x256xf32>
    %23 = arith.divf %21, %22 : vector<32x256xf32>
    %24 = arith.mulf %18, %23 : vector<32x256xf32>
    %c0_11 = arith.constant 0 : index
    %c0_12 = arith.constant 0 : index
    %25 = vector.load %arg7[%c0_11, %c0_12] : memref<4x32xbf16, #tpu.memory_space<vmem>>, vector<4x32xbf16>
    %26 = arith.truncf %24 : vector<32x256xf32> to vector<32x256xbf16>
    %cst_13 = arith.constant dense<0.000000e+00> : vector<4x256xf32>
    %27 = tpu.matmul %25, %26, %cst_13 {dimension_numbers = #tpu.dot_dimension_numbers<[1], [0], [0], [1], [0, 0, 1, 1], [], []>} : vector<4x32xbf16>, vector<32x256xbf16>, vector<4x256xf32> -> vector<4x256xf32>
    %c0_14 = arith.constant 0 : index
    %c0_15 = arith.constant 0 : index
    %28 = vector.load %arg8[%c0_14, %c0_15] : memref<4x256xf32, #tpu.memory_space<vmem>>, vector<4x256xf32>
    %29 = arith.addf %27, %28 : vector<4x256xf32>
    %30 = arith.subf %29, %5 : vector<4x256xf32>
    %31 = arith.mulf %30, %30 : vector<4x256xf32>
    %cst_16 = arith.constant dense<0.000000e+00> : vector<4xf32>
    %32 = vector.multi_reduction <add>, %31, %cst_16 [1] : vector<4x256xf32> to vector<4xf32>
    %33 = vector.shape_cast %32 : vector<4xf32> to vector<4x1xf32>
    %cst_17 = arith.constant dense<0.000000e+00> : vector<1xf32>
    %34 = vector.multi_reduction <add>, %33, %cst_17 [0] : vector<4x1xf32> to vector<1xf32>
    %35 = vector.shape_cast %34 : vector<1xf32> to vector<1x1xf32>
    %cst_18 = arith.constant 9.765625E-4 : f32
    %36 = vector.broadcast %cst_18 : f32 to vector<1x1xf32>
    %37 = arith.mulf %35, %36 : vector<1x1xf32>
    %38 = vector.shape_cast %37 : vector<1x1xf32> to vector<1x1xf32>
    %39 = vector.broadcast %38 : vector<1x1xf32> to vector<8x128xf32>
    %c0_19 = arith.constant 0 : index
    %c0_20 = arith.constant 0 : index
    %c0_21 = arith.constant 0 : index
    %40 = vector.load %arg9[%c0_19, %c0_20, %c0_21] : memref<1x8x128xf32, #tpu.memory_space<vmem>>, vector<1x8x128xf32>
    %41 = vector.shape_cast %40 : vector<1x8x128xf32> to vector<8x128xf32>
    %42 = vector.shape_cast %39 : vector<8x128xf32> to vector<1x8x128xf32>
    tpu.vector_store %arg9[%c0_19, %c0_20, %c0_21], %42 {strides = array<i32>} : memref<1x8x128xf32, #tpu.memory_space<vmem>>, vector<1x8x128xf32>,
    return
  }
  func.func @transform_0(%arg0: i32) -> i32 {
    %c0_i32 = arith.constant 0 : i32
    %c0_i32_0 = arith.constant 0 : i32
    return %c0_i32 : i32
  }
  func.func @transform_1(%arg0: i32) -> i32 {
    %c0_i32 = arith.constant 0 : i32
    %c0_i32_0 = arith.constant 0 : i32
    return %c0_i32 : i32
  }
  func.func @transform_2(%arg0: i32) -> (i32, i32, i32) {
    %c0_i32 = arith.constant 0 : i32
    %c0_i32_0 = arith.constant 0 : i32
    %c0_i32_1 = arith.constant 0 : i32
    return %arg0, %c0_i32, %c0_i32_0 : i32, i32, i32
  }
  func.func @transform_3(%arg0: i32) -> (i32, i32, i32) {
    %c0_i32 = arith.constant 0 : i32
    %c0_i32_0 = arith.constant 0 : i32
    %c0_i32_1 = arith.constant 0 : i32
    return %arg0, %c0_i32, %c0_i32_0 : i32, i32, i32
  }
  func.func @transform_4(%arg0: i32) -> (i32, i32) {
    %c0_i32 = arith.constant 0 : i32
    %c0_i32_0 = arith.constant 0 : i32
    %c0_i32_1 = arith.constant 0 : i32
    return %c0_i32, %c0_i32_0 : i32, i32
  }
  func.func @transform_5(%arg0: i32) -> (i32, i32, i32) {
    %c0_i32 = arith.constant 0 : i32
    %c0_i32_0 = arith.constant 0 : i32
    %c0_i32_1 = arith.constant 0 : i32
    return %arg0, %c0_i32, %c0_i32_0 : i32, i32, i32
  }
  func.func @transform_6(%arg0: i32) -> (i32, i32) {
    %c0_i32 = arith.constant 0 : i32
    %c0_i32_0 = arith.constant 0 : i32
    %c0_i32_1 = arith.constant 0 : i32
    return %c0_i32, %c0_i32_0 : i32, i32
  }
  func.func @transform_7(%arg0: i32) -> (i32, i32) {
    %c0_i32 = arith.constant 0 : i32
    %c0_i32_0 = arith.constant 0 : i32
    %c0_i32_1 = arith.constant 0 : i32
    return %c0_i32, %c0_i32_0 : i32, i32
  }
  func.func @transform_8(%arg0: i32) -> (i32, i32, i32) {
    %c0_i32 = arith.constant 0 : i32
    %c0_i32_0 = arith.constant 0 : i32
    %c0_i32_1 = arith.constant 0 : i32
    return %arg0, %c0_i32, %c0_i32_0 : i32, i32, i32
  }
}

</mosaic_0001>

<bundles_post_ra>
// kernel: tpu_custom_call.1
= control target key start
LH: loop header
LB: loop body
LE: loop exit
PB: predicated region body
PF: predicated region fallthrough
CT: control target
= control target key end

     0   :  { %s1549_s0 = inlined_call_operand.vmem [shape: f32[4], index: 0, kind: input, shape index: {}]   ;;  %s1550_s1 = inlined_call_operand.vmem [shape: f32[4], index: 1, kind: input, shape index: {}]   ;;  %s1551_s2 = inlined_call_operand.hbm [shape: f32[4,4,256], index: 2, kind: input, shape index: {}]   ;;  %s1552_s3 = inlined_call_operand.hbm [shape: f32[4,4,256], index: 3, kind: input, shape index: {}]   ;;  %s1553_s4 = inlined_call_operand.vmem [shape: bf16[32,4], index: 4, kind: input, shape index: {}]   ;;  %s1554_s5 = inlined_call_operand.hbm [shape: f32[4,32,256], index: 5, kind: input, shape index: {}]   ;;  %s1555_s6 = inlined_call_operand.vmem [shape: bf16[4,32], index: 6, kind: input, shape index: {}]   ;;  %s1556_s7 = inlined_call_operand.vmem [shape: f32[4,256], index: 7, kind: input, shape index: {}]   ;;  %s1557_s8 = inlined_call_operand.hbm [shape: f32[4,8,128], index: 8, kind: output, shape index: {}]  }
   0x1   :  { %1572 = sst [smem:[#allocation21_spill]] %s1549_s0 }
   0x2   :  { %1573 = sst [smem:[#allocation22_spill]] %s1550_s1 }
   0x3   :  { %1574 = sst [smem:[#allocation23_spill]] %s1552_s3 }
   0x4   :  { %13 = vsyncpa [#allocation5], 0 }
   0x5   :  { %14 = vsyncpa [#allocation7], 0 }
   0x6   :  { %15 = vsyncpa [#allocation3], 0 }
   0x7   :  { %17 = vsyncpa [#allocation3 + $0x1], 0 }
   0x8   :  { %18 = vsyncpa [#allocation10], 0 }
   0x9   :  { %20 = vsyncpa [#allocation10 + $0x1], 0 }
   0xa   :  { %21 = vsyncpa [#allocation4], 0 }
   0xb   :  { %23 = vsyncpa [#allocation4 + $0x1], 0  ;;  %s1221_s27 = smov 0   ;;  %s1223_s28 = smov 0  }
   0xc   :  { %s1225_s29 = smov 0   ;;  %s1227_s30 = smov 0  }
   0xd LB: > { %1575 = sst [smem:[#allocation18_spill]] %s1161_s29  ;;  %s1242_s9 = sadd.s32 1, %s1165_s30   ;;  %s1165_s30 = sphi %s1227_s30, %s1601_s30   ;;  %s1161_s29 = sphi %s1225_s29, %s1603_s29   ;;  %s1157_s28 = sphi %s1223_s28, %s1605_s28   ;;  %s1153_s27 = sphi %s1221_s27, %s1604_s27  }
   0xe   : > { %1576 = sst [smem:[#allocation19_spill]] %s1242_s9  ;;  %s78_s10 = sadd.s32 1, %s1161_s29 }
   0xf   : > { %s75_s11 = ssub.s32 %s1165_s30, %s1242_s9  ;;  %p1558_p0 = scmp.ne.s32.totalorder %s1161_s29, %s1157_s28 }
  0x10   : > { %p76_p1 = scmp.eq.s32.totalorder %s75_s11, 0  ;;  %p86_p2 = scmp.eq.s32.totalorder %s1165_s30, 0 }
  0x11   : > { %p890_p3 = scmp.lt.s32.totalorder %s1165_s30, 4  ;;  %s1258_s13 = sand.u32 1, %s1161_s29  }
  0x12   : > { %s1252_s12 = scalar_select %p76_p1, %s1161_s29, %s78_s10  }
  0x13   : > { %p87_p4 = por %p86_p2, %p1558_p0  ;;  %s1559_s14 = sshll.u32 %s1258_s13, 3 }
  0x14   : > { %1577 = sst [smem:[#allocation20_spill]] %s1252_s12  ;;  %s1560_s15 = sshll.u32 %s1165_s30, 7 }
  0x15   : > { %p1262_p5 = pnand %p890_p3, %p87_p4  ;;  %s306_s17 = sand.u32 1, %s1165_s30  }
  0x16   : > { %s1579_s3 = sld [smem:[#allocation23_spill]]  ;;  %s310_s21 = scalar_lea.vmem [#allocation9], %s1559_s14 }
  0x17   : > { %s1578_s16 = scalar_select %p1262_p5, 1, 0 }
  0x18   : > { %s318_s22 = sshll.u32 %s310_s21, 4  ;;  %s820_s23 = sshll.u32 %s1258_s13, 6  ;;  %s1277_s22 = int_to_ptr.vmem [resolvable:$true] %s318_s22 }
  0x19   : > { %s1279_s24 = scalar_lea.sflag [#allocation10], %s306_s17  ;;  %p1285_p7 = pneg %p1262_p5 }
  0x1b   : > { %s1580_s26 = scalar_select %p1285_p7, 1, 0 }
  0x1c   : > { %s1272_s20 = scalar_lea.hbm %s1579_s3, %s1560_s15  ;;  %s972_s18 = scalar_lea.hbm %s1579_s3, 512 }
  0x1d   : > { %s967_s25 = scalar_lea.hbm %s1272_s20, 128  ;;  %p973_p10 = scmp.lt.u32.totalorder %s1272_s20, %s1579_s3 }
  0x1e   : > { %p968_p6 = scmp.ne.s32.totalorder %s1272_s20, %s967_s25  ;;  %p974_p11 = scmp.lt.u32.totalorder %s972_s18, %s967_s25 }
  0x1f   : > { %p976_p13 = scmp.lt.u32.totalorder %s967_s25, %s1272_s20 }
  0x20   : > { %p970_p8 = pnand %p1285_p7, %p968_p6  ;;  %p975_p12 = por %p974_p11, %p973_p10 }
  0x22   : > { %p971_p9 = pneg %p970_p8  ;;  %p977_p1 = por %p976_p13, %p975_p12 }
  0x24   : > { %p978_p2 = pnand %p977_p1, %p971_p9 }
  0x26   : > { %981 = shalt.err (!%p978_p2)
}
  0x27   : > { %s982_s17 = scalar_lea.vmem %s1277_s22, 128  ;;  %s1167_s10 = smov [#allocation9]  }
  0x28   : > { %p983_p3 = scmp.ne.s32.totalorder %s1277_s22, %s982_s17  ;;  %s987_s11 = sshll.u32 %s1167_s10, 4  ;;  %s988_s11 = int_to_ptr.vmem [resolvable:$false] %s987_s11 }
  0x29   : > { %s989_s19 = scalar_lea.vmem %s988_s11, 256  ;;  %p990_p8 = scmp.lt.s32.totalorder %s1277_s22, %s988_s11 }
  0x2a   : > { %p985_p4 = pnand %p983_p3, %p1285_p7  ;;  %p991_p0 = scmp.lt.s32.totalorder %s989_s19, %s982_s17 }
  0x2c   : > { %p986_p6 = pneg %p985_p4  ;;  %p992_p10 = por %p991_p0, %p990_p8 }
  0x2e   : > { %p993_p11 = pnand %p992_p10, %p986_p6 }
  0x30   : > { %996 = shalt.err (!%p993_p11)
}
  0x31   : > { %880 = dma.hbm_to_vmem [thread:$0]  (!%p1262_p5), %s1272_s20, 128, %s1277_s22, %s1279_s24  }
  0x32   : > { %s329_s25 = scalar_lea.vmem [#allocation11], %s820_s23  ;;  %s1314_s21 = sadd.s32 4294967295, %s1165_s30  }
  0x33   : > { %s336_s18 = sshll.u32 %s329_s25, 4  ;;  %s809_s17 = sadd.s32 4294967294, %s1165_s30   ;;  %s1311_s18 = int_to_ptr.vmem [resolvable:$true] %s336_s18 }
  0x34   : > { %p91_p0 = scmp.ne.s32.totalorder %s1157_s28, %s1153_s27  ;;  %p1564_p9 = scmp.eq.s32.totalorder %s1314_s21, 0 }
  0x35   : > { %p230_p12 = scmp.eq.s32.totalorder %s1314_s21, 3  ;;  %p236_p13 = scmp.eq.s32.totalorder %s809_s17, 3 }
  0x36   : > { %p1323_p1 = por %p1564_p9, %p91_p0  ;;  %p810_p2 = scmp.ge.s32.totalorder %s1165_s30, 1 }
  0x37   : > { %p1582_p3 = scmp.ne.s32.totalorder %s1161_s29, %s1157_s28  ;;  %p1335_p6 = por %p236_p13, %p91_p0 }
  0x38   : > { %s1581_s20 = scalar_select %p1323_p1, 1, 0 }
  0x39   : > { %p1331_p4 = por %p230_p12, %p1582_p3  ;;  %p243_p8 = scmp.lt.s32.totalorder %s1165_s30, 5 }
  0x3a   : > { %s1584_s23 = scalar_select %p1335_p6, 1, 0 }
  0x3b   : > { %s1583_s22 = scalar_select %p1331_p4, 1, 0 }
  0x3c   : > { %s1585_s0 = sld [smem:[#allocation21_spill]]  ;;  %p1343_p10 = pnand %p810_p2, %p243_p8 }
  0x3d   : > { %s1587_s1 = sld [smem:[#allocation22_spill]]  ;;  %s1589_s10 = sshll.u32 %s1165_s30, 7 }
  0x3e   : > { %s1586_s25 = scalar_select %p1343_p10, 1, 0 }
  0x3f   : > { %p867_p11 = pneg %p1343_p10  ;;  %s1365_s12 = scalar_lea.hbm %s1551_s2, %s1589_s10 }
  0x40   : > { %s1590_s29 = sshll.u32 %s1258_s13, 3  ;;  %s850_s17 = sshll.u32 %s1165_s30, 10 }
  0x41   : > { %p1356_p0 = pnand %p867_p11, %p1564_p9  ;;  %s291_s9 = scalar_lea.vmem [#allocation8], %s1590_s29 }
  0x42   : > { %s256_s19 = sshll.u32 %s1585_s0, 4  ;;  %s299_s14 = sshll.u32 %s291_s9, 4  ;;  %s257_s19 = int_to_ptr.vmem [resolvable:$true] %s256_s19  ;;  %s1370_s14 = int_to_ptr.vmem [resolvable:$true] %s299_s14 }
  0x43   : > { %s267_s15 = sshll.u32 %s1587_s1, 4  ;;  %s997_s1 = scalar_lea.vmem %s257_s19, 16  ;;  %s1352_s15 = int_to_ptr.vmem [resolvable:$true] %s267_s15 }
  0x44   : > { %p998_p12 = scmp.ne.s32.totalorder %s257_s19, %s997_s1  ;;  %p999_p13 = pneg %p1356_p0 }
  0x45   : > { %p1005_p8 = scmp.lt.s32.totalorder %s257_s19, %s257_s19  ;;  %p1006_p11 = scmp.lt.s32.totalorder %s997_s1, %s997_s1 }
  0x46   : > { %p1000_p2 = pnand %p999_p13, %p998_p12 }
  0x47   : > { %p1007_p9 = por %p1006_p11, %p1005_p8 }
  0x48   : > { %p1001_p3 = pneg %p1000_p2 }
  0x4a   : > { %p1008_p6 = pnand %p1007_p9, %p1001_p3 }
  0x4c   : > { %1011 = shalt.err (!%p1008_p6)
}
  0x4d   : > { %s1168_s0 = smov [#allocation2]   ;;  %s1012_s29 = scalar_lea.vmem %s1352_s15, 16 }
  0x4e   : > { %870 = dma.vmem_to_smem (!%p1356_p0), %s257_s19, 16, %s1168_s0, [#allocation5]  }
  0x4f   : > { %p1013_p4 = scmp.ne.s32.totalorder %s1352_s15, %s1012_s29  ;;  %p1020_p5 = scmp.lt.s32.totalorder %s1352_s15, %s1352_s15 }
  0x50   : > { %p1021_p12 = scmp.lt.s32.totalorder %s1012_s29, %s1012_s29 }
  0x51   : > { %p1015_p1 = pnand %p1013_p4, %p999_p13 }
  0x52   : > { %p1022_p2 = por %p1021_p12, %p1020_p5 }
  0x53   : > { %p1016_p10 = pneg %p1015_p1 }
  0x55   : > { %p1023_p7 = pnand %p1022_p2, %p1016_p10 }
  0x57   : > { %1026 = shalt.err (!%p1023_p7)
}
  0x58   : > { %s1169_s1 = smov [#allocation6]   ;;  %s288_s9 = scalar_lea.sflag [#allocation3], %s1258_s13 }
  0x59   : > { %873 = dma.vmem_to_smem (!%p1356_p0), %s1352_s15, 16, %s1169_s1, [#allocation7]  }
  0x5a   : > { %s1027_s19 = scalar_lea.hbm %s1365_s12, 128  ;;  %p1591_p1 = scmp.ne.s32.totalorder %s1580_s26, 0 }
  0x5b   : > { %p1028_p9 = scmp.ne.s32.totalorder %s1365_s12, %s1027_s19  ;;  %s1032_s0 = scalar_lea.hbm %s1551_s2, 512 }
  0x5c   : > { %p1033_p5 = scmp.lt.u32.totalorder %s1365_s12, %s1551_s2  ;;  %p1034_p7 = scmp.lt.u32.totalorder %s1032_s0, %s1027_s19 }
  0x5d   : > { %p1030_p4 = pnand %p1028_p9, %p1591_p1  ;;  %p1036_p13 = scmp.lt.u32.totalorder %s1027_s19, %s1365_s12 }
  0x5e   : > { %p1035_p10 = por %p1034_p7, %p1033_p5 }
  0x5f   : > { %p1031_p6 = pneg %p1030_p4 }
  0x60   : > { %p1037_p3 = por %p1036_p13, %p1035_p10 }
  0x62   : > { %p1038_p8 = pnand %p1037_p3, %p1031_p6 }
  0x64   : > { %1041 = shalt.err (!%p1038_p8)
}
  0x65   : > { %s1042_s13 = scalar_lea.vmem %s1370_s14, 128  ;;  %s1170_s15 = smov [#allocation8]  }
  0x66   : > { %p1043_p0 = scmp.ne.s32.totalorder %s1370_s14, %s1042_s13  ;;  %s1047_s1 = sshll.u32 %s1170_s15, 4  ;;  %s1048_s1 = int_to_ptr.vmem [resolvable:$false] %s1047_s1 }
  0x67   : > { %s1049_s10 = scalar_lea.vmem %s1048_s1, 256  ;;  %p1050_p2 = scmp.lt.s32.totalorder %s1370_s14, %s1048_s1 }
  0x68   : > { %p1045_p11 = pnand %p1043_p0, %p1591_p1  ;;  %p1051_p9 = scmp.lt.s32.totalorder %s1049_s10, %s1042_s13 }
  0x6a   : > { %p1046_p12 = pneg %p1045_p11  ;;  %p1052_p4 = por %p1051_p9, %p1050_p2 }
  0x6c   : > { %p1053_p5 = pnand %p1052_p4, %p1046_p12 }
  0x6e   : > { %1056 = shalt.err (!%p1053_p5)
}
  0x6f   : > { %p1592_p6 = scmp.ne.s32.totalorder %s1578_s16, 0  ;;  %s1410_s0 = scalar_lea.hbm %s1554_s5, %s850_s17 }
  0x70   : > { %s1057_s29 = scalar_lea.hbm %s1410_s0, 1024  ;;  %s1062_s15 = scalar_lea.hbm %s1554_s5, 4096 }
  0x71   : > { %877 = dma.hbm_to_vmem [thread:$0]  (!%p1592_p6), %s1365_s12, 128, %s1370_s14, %s288_s9  }
  0x72   : > { %p1058_p7 = scmp.ne.s32.totalorder %s1410_s0, %s1057_s29  ;;  %p1063_p3 = scmp.lt.u32.totalorder %s1410_s0, %s1554_s5 }
  0x73   : > { %p1064_p8 = scmp.lt.u32.totalorder %s1062_s15, %s1057_s29  ;;  %p1066_p11 = scmp.lt.u32.totalorder %s1057_s29, %s1410_s0 }
  0x74   : > { %p1060_p10 = pnand %p1058_p7, %p1591_p1 }
  0x75   : > { %p1065_p0 = por %p1064_p8, %p1063_p3 }
  0x76   : > { %p1061_p13 = pneg %p1060_p10 }
  0x77   : > { %p1067_p12 = por %p1066_p11, %p1065_p0 }
  0x79   : > { %p1068_p2 = pnand %p1067_p12, %p1061_p13 }
  0x7b   : > { %1071 = shalt.err (!%p1068_p2)
}
  0x7c   : > { %s1072_s17 = scalar_lea.vmem %s1311_s18, 1024  ;;  %s1171_s9 = smov [#allocation11]  }
  0x7d   : > { %p1073_p9 = scmp.ne.s32.totalorder %s1311_s18, %s1072_s17  ;;  %s1077_s1 = sshll.u32 %s1171_s9, 4  ;;  %s1078_s1 = int_to_ptr.vmem [resolvable:$false] %s1077_s1 }
  0x7e   : > { %s1079_s10 = scalar_lea.vmem %s1078_s1, 2048  ;;  %p1080_p7 = scmp.lt.s32.totalorder %s1311_s18, %s1078_s1 }
  0x7f   : > { %p1075_p4 = pnand %p1073_p9, %p1591_p1  ;;  %p1081_p10 = scmp.lt.s32.totalorder %s1079_s10, %s1072_s17 }
  0x81   : > { %p1076_p5 = pneg %p1075_p4  ;;  %p1082_p3 = por %p1081_p10, %p1080_p7 }
  0x83   : > { %p1083_p8 = pnand %p1082_p3, %p1076_p5 }
  0x85   : > { %1086 = shalt.err (!%p1083_p8)
}
  0x86   : > { %s1172_s19 = smov 256   ;;  %s1173_s11 = smov 16  }
  0x87   : > { %883 = dma.hbm_to_vmem [thread:$0]  (!%p1592_p6), %s1410_s0, 1024, %s1311_s18, %s1279_s24, %s1172_s19, %s1172_s19, %s1173_s11  }
  0x88   : > { %p1593_p1 = scmp.ne.s32.totalorder %s1586_s25, 0 }
  0x89   : > { %p1594_p13 = scmp.eq.s32.totalorder (!%p1593_p1), %s1314_s21, 0 }
  0x8a   : > { %348 = sbr.rel (%p1593_p1) target bundleno = 832 (0x340), region = 52 }
  0x91   : > { %1132 = dma.done.wait (%p1594_p13), [#allocation5], 16   ;;  %p1595_p0 = pmov %p1594_p13 }
  0x93   : > { %1134 = vsyncadd (%p1595_p0), [#allocation5], 4294967280  ;;  %p1596_p11 = pmov %p1595_p0 }
  0x94   : > { %p1597_p12 = pmov %p1595_p0 }
  0x95   : > { %1136 = dma.done.wait (%p1596_p11), [#allocation7], 16  }
  0x96   : > { %1138 = vsyncadd (%p1597_p12), [#allocation7], 4294967280  ;;  %s1445_s26 = sand.u32 1, %s1157_s28   ;;  %p1598_p6 = scmp.ne.s32.totalorder %s1581_s20, 0 }
  0x97   : > { %s1448_s16 = sshll.u32 %s1445_s26, 3  ;;  %s359_s24 = scalar_lea.sflag [#allocation3], %s1445_s26 }
  0x98   : > { %s362_s18 = scalar_lea.vmem [#allocation8], %s1448_s16 }
  0x99   : > { %1140 = dma.done.wait (%p1598_p6), %s359_s24, 128  }
  0x9a   : > { %1142 = vsyncadd (%p1598_p6), %s359_s24, 4294967168  ;;  %s367_s25 = sand.u32 1, %s1314_s21   ;;  %s371_s29 = scalar_lea.vmem [#allocation9], %s1448_s16 }
  0x9b   : > { %s368_s0 = scalar_lea.sflag [#allocation10], %s367_s25 }
  0x9c   : > { %1144 = dma.done.wait (%p1598_p6), %s368_s0, 1152  }
  0x9d   : > { %1146 = vsyncadd (%p1598_p6), %s368_s0, 4294966144  ;;  %s828_s3 = sshll.u32 %s1445_s26, 6 }
  0x9e   : > { %s1463_s13 = scalar_lea.vmem [#allocation11], %s828_s3 }
  0x9f   : > { %385 = sfence }
  0xa0   : > { %s425_s15 = sld [smem:[#allocation2 + %s1314_s21]]  ;;  %v1174_v0 = vmov 0   ;;  %v1467_v1 = vld [vmem:[%s371_s29] sm:$0xff]  ;;  %v428_v2 = vld [vmem:[%s362_s18] sm:$0xff]  ;;  %vm468_vm0 = vcmask 1041408   ;;  %vm461_vm1 = vcmask 31744  }
  0xa1   : > { %s426_s12 = sld [smem:[#allocation6 + %s1314_s21]]  ;;  %507 = vmatprep.mubr.bf16.mxu0 %v1174_v0  ;;  %629 = vmatprep.mubr.bf16.mxu1 %v1174_v0  ;;  %v931_v12 = vld [vmem:[%s1553_s4] sm:$0xff]   ;;  %v932_v13 = vld [vmem:[%s1553_s4 + $0x8] sm:$0xff]   ;;  %v445_v17 = vld [vmem:[%s1463_s13 + $0x10] sm:$0xff]  ;;  %vm593_vm2 = vcmask 261120   ;;  %vm645_vm3 = vcmask 1043456  }
  0xa2   : > { %v443_v14 = vld [vmem:[%s1463_s13] sm:$0xff]  ;;  %v444_v15 = vld [vmem:[%s1463_s13 + $0x8] sm:$0xff]  ;;  %v446_v20 = vld [vmem:[%s1463_s13 + $0x18] sm:$0xff]  ;;  %s845_s24 = sshll.u32 %s1314_s21, 7  ;;  %s423_s18 = scalar_lea.vmem [#allocation12], %s1448_s16 }
  0xa3   : > { %v447_v30 = vld [vmem:[%s1463_s13 + $0x20] sm:$0xff]  ;;  %v448_v31 = vld [vmem:[%s1463_s13 + $0x28] sm:$0xff]  ;;  %v449_v33 = vld [vmem:[%s1463_s13 + $0x30] sm:$0xff]  ;;  %s674_s25 = sshll.u32 %s423_s18, 4  ;;  %s1506_s3 = scalar_lea.hbm %s1557_s8, %s845_s24  ;;  %s1508_s25 = int_to_ptr.vmem [resolvable:$true] %s674_s25 }
  0xa4   : > { %v450_v36 = vld [vmem:[%s1463_s13 + $0x38] sm:$0xff]  ;;  %s661_s13 = scalar_lea.sflag [#allocation4], %s1445_s26  ;;  %p1599_p9 = scmp.ne.s32.totalorder %s1583_s22, 0 }
  0xa5   : > { %s1175_s21 = smov [#allocation12]  }
  0xa6   : > { %v429_v3 = vstv %s425_s15  ;;  %s1087_s15 = scalar_lea.vmem %s1508_s25, 128  ;;  %s1091_s16 = sshll.u32 %s1175_s21, 4  ;;  %s1092_s16 = int_to_ptr.vmem [resolvable:$false] %s1091_s16 }
  0xa7   : > { %v431_v4 = vstv %s426_s12  ;;  %v430_v5 = vmul.f32 %v429_v3, %v428_v2  ;;  %p1088_p2 = scmp.ne.s32.totalorder %s1508_s25, %s1087_s15  ;;  %s1093_s12 = scalar_lea.vmem %s1092_s16, 256 }
  0xa8   : > { %v432_v6 = vmul.f32 %v431_v4, %v1467_v1  ;;  %p1094_p7 = scmp.lt.s32.totalorder %s1508_s25, %s1092_s16  ;;  %p1095_p10 = scmp.lt.s32.totalorder %s1093_s12, %s1087_s15 }
  0xa9   : > { %p1089_p4 = pnand %p1088_p2, %p1599_p9 }
  0xaa   : > { %v433_v7 = vadd.f32 %v432_v6, %v430_v5  ;;  %p1096_p3 = por %p1095_p10, %p1094_p7 }
  0xab   : > { %p1090_p5 = pneg %p1089_p4 }
  0xac   : > { %v439_v8 = vcombine.high %v433_v7, %v433_v7  ;;  %v441_v9 = vpack.c.bf16 %v433_v7, %v433_v7 }
  0xad   : > { %p1097_p8 = pnand %p1096_p3, %p1090_p5 }
  0xae   : > { %v442_v10 = vpack.c.bf16 %v439_v8, %v439_v8  ;;  %v470_v11 = vsel %vm468_vm0, %v441_v9, 0 }
  0xb0   : > { %832 = vmatprep.subr.msk.bf16.mxu0 %vm468_vm0, %v442_v10 }
  0xb1   : > { %476 = vmatpush1.bf16.msra.mxu0 %v470_v11 }
  0xb4   : > { %833 = vmatmul.mubr.msk.bf16.vlgmr.msra.gmra.mrb[0].mxu0 %vm461_vm1, %v931_v12 }
  0xb5   : > { %517 = vmatprep.mubr.bf16.mxu0 %v1174_v0 }
  0xbc   : > { %834 = vmatmul.mubr.msk.bf16.gmra.mrb[4].mxu0 %vm461_vm1, %v932_v13 }
 0x187   : > { %v509_v16 = vpop.f32.mrb[0].mxu0 }
 0x188   : > { %v1479_v18 = vadd.f32 %v509_v16, %v443_v14  ;;  %v511_v19 = vpop.f32.mrb[1].mxu0 }
 0x189   : > { %v1482_v21 = vadd.f32 %v511_v19, %v444_v15  ;;  %v513_v22 = vpop.f32.mrb[2].mxu0 }
 0x18a   : > { %v835_v23 = vmul.f32 -1.442695, %v1479_v18  ;;  %v514_v24 = vadd.f32 %v513_v22, %v445_v17  ;;  %v515_v25 = vpop.f32.mrb[3].mxu0 }
 0x18b   : > { %v836_v26 = vmul.f32 -1.442695, %v1482_v21  ;;  %v516_v27 = vadd.f32 %v515_v25, %v446_v20  ;;  %v589_v20 = vld [vmem:[%s1556_s7] sm:$0xff] }
 0x18c   : > { %935 = vpow2.f32 %v835_v23  ;;  %v837_v28 = vmul.f32 -1.442695, %v514_v24  ;;  %v639_v23 = vcombine.high %v1467_v1, %v1467_v1 }
 0x18d   : > { %937 = vpow2.f32 %v836_v26  ;;  %v838_v29 = vmul.f32 -1.442695, %v516_v27 }
 0x18e   : > { %939 = vpow2.f32 %v837_v28 }
 0x18f   : > { %941 = vpow2.f32 %v838_v29  ;;  %v519_v32 = vpop.f32.mrb[4].mxu0 }
 0x190   : > { %v520_v34 = vadd.f32 %v519_v32, %v447_v30  ;;  %v521_v35 = vpop.f32.mrb[5].mxu0 }
 0x191   : > { %v522_v37 = vadd.f32 %v521_v35, %v448_v31  ;;  %v523_v38 = vpop.f32.mrb[6].mxu0 }
 0x192   : > { %v839_v39 = vmul.f32 -1.442695, %v520_v34  ;;  %v524_v40 = vadd.f32 %v523_v38, %v449_v33  ;;  %v525_v41 = vpop.f32.mrb[7].mxu0 }
 0x193   : > { %v840_v42 = vmul.f32 -1.442695, %v522_v37  ;;  %v526_v43 = vadd.f32 %v525_v41, %v450_v36 }
 0x194   : > { %943 = vpow2.f32 %v839_v39  ;;  %v841_v44 = vmul.f32 -1.442695, %v524_v40 }
 0x195   : > { %945 = vpow2.f32 %v840_v42  ;;  %v842_v45 = vmul.f32 -1.442695, %v526_v43 }
 0x196   : > { %v936_v46 = vpop.eup %935  ;;  %947 = vpow2.f32 %v841_v44 }
 0x197   : > { %v938_v47 = vpop.eup %937  ;;  %v552_v48 = vadd.f32 1.0, %v936_v46  ;;  %949 = vpow2.f32 %v842_v45 }
 0x198   : > { %v940_v49 = vpop.eup %939  ;;  %v553_v50 = vadd.f32 1.0, %v938_v47 }
 0x199   : > { %v942_v51 = vpop.eup %941  ;;  %951 = vrcp.f32 %v552_v48  ;;  %v554_v52 = vadd.f32 1.0, %v940_v49 }
 0x19a   : > { %953 = vrcp.f32 %v553_v50  ;;  %v555_v53 = vadd.f32 1.0, %v942_v51 }
 0x19b   : > { %955 = vrcp.f32 %v554_v52 }
 0x19c   : > { %957 = vrcp.f32 %v555_v53 }
 0x19e   : > { %v944_v54 = vpop.eup %943 }
 0x19f   : > { %v946_v55 = vpop.eup %945  ;;  %v556_v56 = vadd.f32 1.0, %v944_v54 }
 0x1a0   : > { %v948_v57 = vpop.eup %947  ;;  %v557_v58 = vadd.f32 1.0, %v946_v55 }
 0x1a1   : > { %v950_v59 = vpop.eup %949  ;;  %959 = vrcp.f32 %v556_v56  ;;  %v558_v60 = vadd.f32 1.0, %v948_v57 }
 0x1a2   : > { %961 = vrcp.f32 %v557_v58  ;;  %v559_v61 = vadd.f32 1.0, %v950_v59 }
 0x1a3   : > { %v952_v62 = vpop.eup %951  ;;  %963 = vrcp.f32 %v558_v60 }
 0x1a4   : > { %v954_v63 = vpop.eup %953  ;;  %965 = vrcp.f32 %v559_v61  ;;  %v576_v3 = vmul.f32 %v952_v62, %v1479_v18  ;;  %v584_v18 = vld [vmem:[%s1555_s6] sm:$0x3] }
 0x1a5   : > { %v956_v0 = vpop.eup %955  ;;  %v577_v5 = vmul.f32 %v954_v63, %v1482_v21  ;;  %v591_v21 = vcombine.high %v589_v20, %v589_v20 }
 0x1a6   : > { %v958_v2 = vpop.eup %957  ;;  %v578_v4 = vmul.f32 %v956_v0, %v514_v24 }
 0x1a7   : > { %v579_v6 = vmul.f32 %v958_v2, %v516_v27 }
 0x1a8   : > { %v585_v7 = vpack.c.bf16 %v578_v4, %v576_v3 }
 0x1a9   : > { %v586_v8 = vpack.c.bf16 %v579_v6, %v577_v5 }
 0x1ab   : > { %v960_v9 = vpop.eup %959  ;;  %597 = vmatprep.subr.bf16.mxu1 %v586_v8 }
 0x1ac   : > { %v962_v10 = vpop.eup %961  ;;  %598 = vmatpush1.bf16.msra.mxu1 %v585_v7  ;;  %v580_v13 = vmul.f32 %v960_v9, %v520_v34 }
 0x1ad   : > { %v964_v11 = vpop.eup %963  ;;  %v581_v15 = vmul.f32 %v962_v10, %v522_v37 }
 0x1ae   : > { %v966_v12 = vpop.eup %965  ;;  %v582_v14 = vmul.f32 %v964_v11, %v524_v40 }
 0x1af   : > { %v583_v16 = vmul.f32 %v966_v12, %v526_v43 }
 0x1b0   : > { %v587_v17 = vpack.c.bf16 %v582_v14, %v580_v13 }
 0x1b1   : > { %v588_v19 = vpack.c.bf16 %v583_v16, %v581_v15 }
 0x1b3   : > { %599 = vmatprep.subr.bf16.mxu1 %v588_v19 }
 0x1b4   : > { %600 = vmatpush1.bf16.msra.mxu1 %v587_v17 }
 0x1b7   : > { %843 = vmatmul.mubr.msk.bf16.vlgmr.msra.gmra.mrb[0].mxu1 %vm593_vm2, %v584_v18 }
 0x28a   : > { %v631_v22 = vpop.f32.mrb[0].mxu1 }
 0x28b   : > { %v632_v24 = vadd.f32 %v631_v22, %v589_v20  ;;  %v633_v25 = vpop.f32.mrb[1].mxu1 }
 0x28c   : > { %v634_v26 = vadd.f32 %v633_v25, %v591_v21  ;;  %v635_v27 = vpop.f32.mrb[2].mxu1 }
 0x28d   : > { %v641_v28 = vsub.f32 %v632_v24, %v1467_v1  ;;  %v636_v29 = vpop.f32.mrb[3].mxu1 }
 0x28e   : > { %v642_v30 = vsub.f32 %v634_v26, %v639_v23 }
 0x28f   : > { %v643_v31 = vmul.f32 %v641_v28, %v641_v28 }
 0x290   : > { %v644_v32 = vmul.f32 %v642_v30, %v642_v30 }
 0x291   : > { %v646_v33 = vsel %vm645_vm3, %v643_v31, 0.0 }
 0x292   : > { %v647_v34 = vsel %vm645_vm3, %v644_v32, 0.0 }
 0x293   : > { %v648_v35 = vadd.f32 %v647_v34, %v646_v33 }
 0x295   : > { %649 = vadd.xlane.f32.xlu0 %v648_v35 }
 0x322   : > { %v650_v36 = vpop.xlane.xlu0 %649 }
 0x323   : > { %v651_v37 = vsel %vm645_vm3, %v650_v36, 0.0 }
 0x324   : > { %v652_v38 = vrot.slane %v651_v37, 4 }
 0x326   : > { %v653_v39 = vadd.f32 %v652_v38, %v651_v37 }
 0x328   : > { %v654_v40 = vrot.slane %v653_v39, 2 }
 0x32a   : > { %v655_v41 = vadd.f32 %v654_v40, %v653_v39 }
 0x32c   : > { %v656_v1 = vrot.slane %v655_v41, 1 }
 0x32e   : > { %v657_v42 = vadd.f32 %v656_v1, %v655_v41 }
 0x330   : > { %v658_v43 = vmul.f32 0.0009765625, %v657_v42 }
 0x332   : > { %659 = vst [vmem:[%s423_s18] sm:$0xff] %v658_v43 }
 0x333   : > { %1100 = shalt.err (!%p1097_p8)
}
 0x334   : > { %s1101_s26 = scalar_lea.hbm %s1506_s3, 128  ;;  %s1105_s17 = scalar_lea.hbm %s1557_s8, 512 }
 0x335   : > { %p1102_p1 = scmp.ne.s32.totalorder %s1506_s3, %s1101_s26  ;;  %p1106_p11 = scmp.lt.u32.totalorder %s1506_s3, %s1557_s8 }
 0x336   : > { %p1107_p12 = scmp.lt.u32.totalorder %s1105_s17, %s1101_s26  ;;  %p1109_p2 = scmp.lt.u32.totalorder %s1101_s26, %s1506_s3 }
 0x337   : > { %p1103_p13 = pnand %p1102_p1, %p1599_p9 }
 0x338   : > { %p1108_p6 = por %p1107_p12, %p1106_p11 }
 0x339   : > { %p1104_p0 = pneg %p1103_p13 }
 0x33a   : > { %p1110_p4 = por %p1109_p2, %p1108_p6 }
 0x33c   : > { %p1111_p5 = pnand %p1110_p4, %p1104_p0 }
 0x33e   : > { %1114 = shalt.err (!%p1111_p5)
}
 0x33f   : > { %865 = dma.vmem_to_hbm [thread:$0]  (%p1599_p9), %s1508_s25, 128, %s1506_s3, %s661_s13  }
 0x340 PF: > { %p893_p7 = scmp.ge.s32.totalorder %s1165_s30, 2  ;;  %s686_s10 = sand.u32 1, %s1153_s27  }
 0x341   : > { %p1600_p10 = scmp.ne.s32.totalorder %s1584_s23, 0  ;;  %s687_s19 = scalar_lea.sflag [#allocation4], %s686_s10 }
 0x343   : > { %p885_p3 = pnand %p893_p7, %p1600_p10 }
 0x345   : > { %1148 = dma.done.wait (!%p885_p3), %s687_s19, 128  }
 0x346   : > { %1150 = vsyncadd (!%p885_p3), %s687_s19, 4294967168  ;;  %s1601_s30 = sld [smem:[#allocation19_spill]]  ;;  %s1602_s11 = sld [smem:[#allocation18_spill]] }
 0x347   : > { %s1603_s29 = sld [smem:[#allocation20_spill]]  ;;  %s1604_s27 = smov %s1157_s28 }
 0x34c   : > { %p26_p8 = scmp.ge.s32.totalorder %s1601_s30, 6   ;;  %s1605_s28 = smov %s1602_s11 }
 0x34e   :  { %28 = sbr.rel (!%p26_p8) target bundleno = 13 (0xd), region = 130 }
 0x355   :  { %692 = vsyncpa [#allocation3], 1 }
 0x356   :  { %694 = vsyncpa [#allocation3 + $0x1], 1 }
 0x357   :  { %695 = vsyncpa [#allocation10], 1 }
 0x358   :  { %697 = vsyncpa [#allocation10 + $0x1], 1 }
 0x359   :  { %698 = vsyncpa [#allocation4], 1 }
 0x35a   :  { %700 = vsyncpa [#allocation4 + $0x1], 1 }
 0x35b   :  { %701 = vsyncpa [#allocation5], 1 }
 0x35c   :  { %703 = vsyncpa [#allocation5 + $0x1], 1 }
 0x35d   :  { %704 = vsyncpa [#allocation7], 1 }

</bundles_post_ra>
